<compile_context>
chip_gen: v7x
topology: tpu7x:2x2x1
jax: 0.10.0
libtpu: 0.0.40
codegen_flags: <defaults>
</compile_context>

<pallas_src>
import functools

import jax
import jax.numpy as jnp
from jax.experimental import pallas as pl
from jax.experimental.pallas import tpu as pltpu

EPS = 1e-08


def _pixel_norm_kernel(x_ref, o_ref, *, inv_c):
    # Block: (1, C, TILE_HW). Reduce over the (full-extent) channel axis.
    x = x_ref[...].astype(jnp.float32)
    # sum * (1/C) instead of mean: avoids a VPU divide; 1/C is a Python const.
    ms = jnp.sum(x * x, axis=1, keepdims=True) * inv_c
    inv = jax.lax.rsqrt(ms + EPS)  # EUP rsqrt
    o_ref[...] = (x * inv).astype(o_ref.dtype)


def _choose_tile_hw(hw, c, itemsize, max_block_bytes=2 * 1024 * 1024):
    """Largest 128-multiple lane tile with one (C, TILE_HW) block <= ~2 MiB.

    With input + output each double-buffered that is <= ~8 MiB of VMEM, which
    stays inside the scoped-VMEM default on every generation (v5e 16 MiB,
    v6e/v7x 32 MiB) while being large enough to sit at the HBM roofline.
    """
    max_lanes = max(128, max_block_bytes // (c * itemsize))
    tile = (max_lanes // 128) * 128
    if hw % 128 == 0:
        tile = min(tile, hw)
    elif hw <= tile:
        tile = hw  # full extent: allowed even when not a 128-multiple
    return tile


def pixel_norm(x):
    """x: (N, C, H, W) -> (N, C, H, W), normalized over C per pixel."""
    N, C, H, W = x.shape
    HW = H * W
    x3d = x.reshape(N, C, HW)  # free reshape, no data movement

    itemsize = jnp.dtype(x.dtype).itemsize
    tile_hw = _choose_tile_hw(HW, C, itemsize)
    grid = (N, pl.cdiv(HW, tile_hw))  # partial last HW tile handled by Pallas

    kernel = functools.partial(_pixel_norm_kernel, inv_c=1.0 / C)

    out3d = pl.pallas_call(
        kernel,
        out_shape=jax.ShapeDtypeStruct((N, C, HW), x.dtype),
        grid_spec=pltpu.PrefetchScalarGridSpec(
            num_scalar_prefetch=0,
            grid=grid,
            # C stays un-tiled (full extent) so the per-pixel mean is exact.
            in_specs=[pl.BlockSpec((1, C, tile_hw), lambda n, t: (n, 0, t))],
            out_specs=pl.BlockSpec((1, C, tile_hw), lambda n, t: (n, 0, t)),
        ),
        compiler_params=pltpu.CompilerParams(
            # Both axes independent -> shardable across v7x's 2 TensorCores.
            dimension_semantics=("parallel", "parallel"),
        ),
    )(x3d)

    return out3d.reshape(N, C, H, W)


def _reference_pixel_norm(x):
    return x / jnp.sqrt(jnp.mean(x ** 2, axis=1, keepdims=True) + EPS)


if __name__ == "__main__":
    key = jax.random.PRNGKey(0)
    x = jax.random.normal(key, (2, 4, 16, 16), dtype=jnp.float32)

    y = pixel_norm(x)
    jax.block_until_ready(y)

    y_ref = _reference_pixel_norm(x)
    assert y.shape == x.shape and y.dtype == x.dtype
    assert jnp.allclose(y, y_ref, atol=1e-5, rtol=1e-5)

    print("KERNEL_OK")
</pallas_src>

<mosaic_0001>
module attributes {stable_mosaic.version = 11 : i64} {
  func.func @_pixel_norm_kernel(%arg0: i32, %arg1: i32, %arg2: memref<1x4x256xf32, #tpu.memory_space<vmem>>, %arg3: memref<1x4x256xf32, #tpu.memory_space<vmem>>) attributes {dimension_semantics = [#tpu.dimension_semantics<parallel>, #tpu.dimension_semantics<parallel>], iteration_bounds = array<i64: 2, 1>, scalar_prefetch = 0 : i64, scratch_operands = 0 : i64, tpu.core_type = #tpu.core_type<tc>, window_params = [{transform_indices = @transform_0, window_bounds = array<i64: 1, 4, 256>}, {transform_indices = @transform_1, window_bounds = array<i64: 1, 4, 256>}]} {
    %c0 = arith.constant 0 : index
    %c0_0 = arith.constant 0 : index
    %c0_1 = arith.constant 0 : index
    %0 = vector.load %arg2[%c0, %c0_0, %c0_1] : memref<1x4x256xf32, #tpu.memory_space<vmem>>, vector<1x4x256xf32>
    %1 = arith.mulf %0, %0 : vector<1x4x256xf32>
    %cst = arith.constant dense<0.000000e+00> : vector<1x256xf32>
    %2 = vector.multi_reduction <add>, %1, %cst [1] : vector<1x4x256xf32> to vector<1x256xf32>
    %3 = vector.shape_cast %2 : vector<1x256xf32> to vector<1x1x256xf32>
    %cst_2 = arith.constant 2.500000e-01 : f32
    %4 = vector.broadcast %cst_2 : f32 to vector<1x1x256xf32>
    %5 = arith.mulf %3, %4 : vector<1x1x256xf32>
    %cst_3 = arith.constant 9.99999993E-9 : f32
    %6 = vector.broadcast %cst_3 : f32 to vector<1x1x256xf32>
    %7 = arith.addf %5, %6 : vector<1x1x256xf32>
    %8 = math.rsqrt %7 : vector<1x1x256xf32>
    %9 = vector.broadcast %8 : vector<1x1x256xf32> to vector<1x4x256xf32>
    %10 = arith.mulf %0, %9 : vector<1x4x256xf32>
    %c0_4 = arith.constant 0 : index
    %c0_5 = arith.constant 0 : index
    %c0_6 = arith.constant 0 : index
    %11 = vector.load %arg3[%c0_4, %c0_5, %c0_6] : memref<1x4x256xf32, #tpu.memory_space<vmem>>, vector<1x4x256xf32>
    tpu.vector_store %arg3[%c0_4, %c0_5, %c0_6], %10 {strides = array<i32>} : memref<1x4x256xf32, #tpu.memory_space<vmem>>, vector<1x4x256xf32>,
    return
  }
  func.func @transform_0(%arg0: i32, %arg1: i32) -> (i32, i32, i32) {
    %c0_i32 = arith.constant 0 : i32
    %c0_i32_0 = arith.constant 0 : i32
    return %arg0, %c0_i32, %arg1 : i32, i32, i32
  }
  func.func @transform_1(%arg0: i32, %arg1: i32) -> (i32, i32, i32) {
    %c0_i32 = arith.constant 0 : i32
    %c0_i32_0 = arith.constant 0 : i32
    return %arg0, %c0_i32, %arg1 : i32, i32, i32
  }
}

</mosaic_0001>

<bundles_post_ra>
// kernel: tpu_custom_call.1
= control target key start
LH: loop header
LB: loop body
LE: loop exit
PB: predicated region body
PF: predicated region fallthrough
CT: control target
= control target key end

     0   :  { %6 = vsyncpa [#allocation3], 0  ;;  %s671_s0 = inlined_call_operand.hbm [shape: f32[2,4,256], index: 0, kind: input, shape index: {}]   ;;  %s672_s1 = inlined_call_operand.hbm [shape: f32[2,4,256], index: 1, kind: output, shape index: {}]  }
   0x1   :  { %8 = vsyncpa [#allocation3 + $0x1], 0 }
   0x2   :  { %9 = vsyncpa [#allocation4], 0 }
   0x3   :  { %11 = vsyncpa [#allocation4 + $0x1], 0  ;;  %s495_s6 = smov 0   ;;  %s497_s7 = smov 0  }
   0x4   :  { %s499_s8 = smov 0   ;;  %s501_s9 = smov 0  }
   0x5   :  { %s503_s10 = smov 0   ;;  %s505_s11 = smov 0  }
   0x6 LB: > { %s286_s12 = sadd.s32 4294967295, %s481_s11   ;;  %s287_s13 = sadd.s32 4294967294, %s481_s11   ;;  %s481_s11 = sphi %s505_s11, %s17_s11   ;;  %s477_s10 = sphi %s503_s10, %s688_s10   ;;  %s473_s9 = sphi %s501_s9, %s687_s9   ;;  %s469_s8 = sphi %s499_s8, %s686_s8   ;;  %s465_s7 = sphi %s497_s7, %s685_s7   ;;  %s461_s6 = sphi %s495_s6, %s684_s6  }
   0x7   : > { %s29_s14 = sadd.s32 1, %s477_s10  ;;  %s38_s15 = sadd.s32 1, %s469_s8 }
   0x8   : > { %p31_p0 = scmp.ge.s32.totalorder %s29_s14, 2  ;;  %p45_p1 = scmp.ne.s32.totalorder %s469_s8, %s465_s7 }
   0x9   : > { %p46_p2 = scmp.eq.s32.totalorder %s481_s11, 0  ;;  %p51_p3 = scmp.ne.s32.totalorder %s465_s7, %s461_s6 }
   0xa   : > { %s690_s14 = smov (%p31_p0, %s29_s14), 0  ;;  %p52_p5 = scmp.eq.s32.totalorder %s286_s12, 0 }
   0xb   : > { %p536_p4 = por %p46_p2, %p45_p1  ;;  %s33_s17 = ssub.s32 %s477_s10, %s690_s14 }
   0xc   : > { %p77_p6 = scmp.eq.s32.totalorder %s286_s12, 1  ;;  %p36_p7 = scmp.eq.s32.totalorder %s33_s17, 0 }
   0xd   : > { %p542_p8 = por %p52_p5, %p51_p3  ;;  %p83_p10 = scmp.eq.s32.totalorder %s287_s13, 1 }
   0xe   : > { %p546_p9 = por %p77_p6, %p45_p1  ;;  %p315_p13 = scmp.lt.s32.totalorder %s481_s11, 2 }
   0xf   : > { %s551_s20 = scalar_select %p36_p7, %s469_s8, %s38_s15  }
  0x10   : > { %s676_s19 = scalar_select %p546_p9, 1, 0 }
  0x11   : > { %p553_p11 = por %p83_p10, %p51_p3  ;;  %s103_s22 = sand.u32 1, %s469_s8  }
  0x12   : > { %s290_s23 = sshll.u32 %s103_s22, 3  ;;  %s301_s24 = sshll.u32 %s477_s10, 7 }
  0x13   : > { %s677_s21 = scalar_select %p553_p11, 1, 0 }
  0x14   : > { %s564_s27 = scalar_lea.hbm %s671_s0, %s301_s24  ;;  %s107_s28 = scalar_lea.vmem [#allocation2], %s290_s23 }
  0x15   : > { %s117_s29 = sshll.u32 %s107_s28, 4  ;;  %p570_p0 = pnand %p315_p13, %p536_p4  ;;  %s566_s29 = int_to_ptr.vmem [resolvable:$true] %s117_s29 }
  0x16   : > { %s104_s2 = scalar_lea.sflag [#allocation3], %s103_s22  ;;  %s369_s3 = scalar_lea.hbm %s564_s27, 128 }
  0x17   : > { %p370_p3 = scmp.ne.s32.totalorder %s564_s27, %s369_s3  ;;  %p371_p5 = pneg %p570_p0 }
  0x18   : > { %s374_s12 = scalar_lea.hbm %s671_s0, 256  ;;  %p375_p4 = scmp.lt.u32.totalorder %s564_s27, %s671_s0 }
  0x19   : > { %p372_p6 = pnand %p371_p5, %p370_p3  ;;  %p376_p10 = scmp.lt.u32.totalorder %s374_s12, %s369_s3 }
  0x1a   : > { %p378_p12 = scmp.lt.u32.totalorder %s369_s3, %s564_s27 }
  0x1b   : > { %p373_p7 = pneg %p372_p6  ;;  %p377_p13 = por %p376_p10, %p375_p4 }
  0x1d   : > { %p379_p1 = por %p378_p12, %p377_p13 }
  0x1f   : > { %p380_p2 = pnand %p379_p1, %p373_p7 }
  0x21   : > { %383 = shalt.err (!%p380_p2)
}
  0x22   : > { %s384_s16 = scalar_lea.vmem %s566_s29, 128  ;;  %s483_s17 = smov [#allocation2]  }
  0x23   : > { %p385_p3 = scmp.ne.s32.totalorder %s566_s29, %s384_s16  ;;  %s389_s22 = sshll.u32 %s483_s17, 4  ;;  %s390_s22 = int_to_ptr.vmem [resolvable:$false] %s389_s22 }
  0x24   : > { %s391_s23 = scalar_lea.vmem %s390_s22, 256  ;;  %p392_p9 = scmp.lt.s32.totalorder %s566_s29, %s390_s22 }
  0x25   : > { %p387_p6 = pnand %p385_p3, %p371_p5  ;;  %p393_p4 = scmp.lt.s32.totalorder %s391_s23, %s384_s16 }
  0x27   : > { %p388_p11 = pneg %p387_p6  ;;  %p394_p10 = por %p393_p4, %p392_p9 }
  0x29   : > { %p395_p12 = pnand %p394_p10, %p388_p11 }
  0x2b   : > { %398 = shalt.err (!%p395_p12)
}
  0x2c   : > { %310 = dma.hbm_to_vmem [thread:$0]  (!%p570_p0), %s564_s27, 128, %s566_s29, %s104_s2  }
  0x2d   : > { %p679_p1 = scmp.lt.s32.totalorder %s481_s11, 3  ;;  %p680_p2 = scmp.ge.s32.totalorder %s481_s11, 1 }
  0x2f   : > { %p123_p5 = pnand %p680_p2, %p679_p1 }
  0x30   : > { %s606_s24 = sand.u32 (!%p123_p5), 1, %s465_s7  }
  0x31   : > { %126 = sbr.rel (%p123_p5) target bundleno = 108 (0x6c), region = 24  ;;  %s294_s25 = sshll.u32 (!%p123_p5), %s606_s24, 3 }
  0x32   : > { %s129_s26 = scalar_lea.sflag (!%p123_p5), [#allocation3], %s606_s24  ;;  %s132_s28 = scalar_lea.vmem (!%p123_p5), [#allocation2], %s294_s25 }
  0x38   : > { %452 = dma.done.wait (%p542_p8), %s129_s26, 128  }
  0x39   : > { %454 = vsyncadd (%p542_p8), %s129_s26, 4294967168  ;;  %v153_v0 = vld [vmem:[%s132_s28] sm:$0xff]  ;;  %vm158_vm0 = vcmask 1043456   ;;  %s150_s18 = scalar_lea.vmem [#allocation5], %s294_s25  ;;  %s302_s29 = sshll.u32 %s473_s9, 7 }
  0x3a   : > { %v154_v1 = vmul.f32 %v153_v0, %v153_v0  ;;  %s202_s27 = sshll.u32 %s150_s18, 4  ;;  %s624_s3 = scalar_lea.hbm %s672_s1, %s302_s29  ;;  %s619_s27 = int_to_ptr.vmem [resolvable:$true] %s202_s27 }
  0x3b   : > { %s186_s4 = scalar_lea.sflag [#allocation4], %s606_s24  ;;  %s399_s5 = scalar_lea.vmem %s619_s27, 128 }
  0x3c   : > { %v156_v2 = vcombine.high %v154_v1, %v154_v1  ;;  %v159_v3 = vsel %vm158_vm0, %v154_v1, 0.0  ;;  %p400_p8 = scmp.ne.s32.totalorder %s619_s27, %s399_s5  ;;  %p681_p9 = scmp.ne.s32.totalorder %s676_s19, 0 }
  0x3d   : > { %v160_v4 = vrot.slane %v159_v3, 4  ;;  %s484_s9 = smov [#allocation5]  }
  0x3e   : > { %v166_v5 = vsel %vm158_vm0, %v156_v2, 0.0  ;;  %p401_p11 = pnand %p400_p8, %p681_p9  ;;  %s403_s12 = sshll.u32 %s484_s9, 4  ;;  %s404_s12 = int_to_ptr.vmem [resolvable:$false] %s403_s12 }
  0x3f   : > { %v161_v6 = vadd.f32 %v160_v4, %v159_v3  ;;  %v167_v7 = vrot.slane %v166_v5, 4  ;;  %s405_s13 = scalar_lea.vmem %s404_s12, 256  ;;  %p406_p7 = scmp.lt.s32.totalorder %s619_s27, %s404_s12 }
  0x40   : > { %p402_p0 = pneg %p401_p11  ;;  %p407_p13 = scmp.lt.s32.totalorder %s405_s13, %s399_s5 }
  0x41   : > { %v162_v8 = vrot.slane %v161_v6, 2  ;;  %v168_v9 = vadd.f32 %v167_v7, %v166_v5 }
  0x42   : > { %p408_p3 = por %p407_p13, %p406_p7 }
  0x43   : > { %v163_v10 = vadd.f32 %v162_v8, %v161_v6  ;;  %v169_v11 = vrot.slane %v168_v9, 2 }
  0x44   : > { %p409_p6 = pnand %p408_p3, %p402_p0 }
  0x45   : > { %v164_v12 = vrot.slane %v163_v10, 1  ;;  %v170_v13 = vadd.f32 %v169_v11, %v168_v9 }
  0x47   : > { %v165_v14 = vadd.f32 %v164_v12, %v163_v10  ;;  %v171_v15 = vrot.slane %v170_v13, 1 }
  0x49   : > { %v172_v16 = vadd.f32 %v171_v15, %v170_v13  ;;  %v173_v17 = vmul.f32 0.25, %v165_v14 }
  0x4b   : > { %v174_v18 = vmul.f32 0.25, %v172_v16  ;;  %v175_v19 = vadd.f32 1e-08, %v173_v17 }
  0x4d   : > { %v176_v20 = vadd.f32 1e-08, %v174_v18  ;;  %365 = vrsqrt.f32 %v175_v19 }
  0x4f   : > { %367 = vrsqrt.f32 %v176_v20 }
  0x57   : > { %v366_v21 = vpop.eup %365 }
  0x59   : > { %v368_v22 = vpop.eup %367 }
  0x5a   : > { %v181_v23 = vcombine.low %v366_v21, %v368_v22 }
  0x5c   : > { %v183_v24 = vmul.f32 %v181_v23, %v153_v0 }
  0x5e   : > { %184 = vst [vmem:[%s150_s18] sm:$0xff] %v183_v24 }
  0x5f   : > { %412 = shalt.err (!%p409_p6)
}
  0x60   : > { %s413_s15 = scalar_lea.hbm %s624_s3, 128  ;;  %s417_s22 = scalar_lea.hbm %s672_s1, 256 }
  0x61   : > { %p414_p4 = scmp.ne.s32.totalorder %s624_s3, %s413_s15  ;;  %p418_p1 = scmp.lt.u32.totalorder %s624_s3, %s672_s1 }
  0x62   : > { %p419_p2 = scmp.lt.u32.totalorder %s417_s22, %s413_s15  ;;  %p421_p8 = scmp.lt.u32.totalorder %s413_s15, %s624_s3 }
  0x63   : > { %p415_p10 = pnand %p414_p4, %p681_p9 }
  0x64   : > { %p420_p5 = por %p419_p2, %p418_p1 }
  0x65   : > { %p416_p12 = pneg %p415_p10 }
  0x66   : > { %p422_p11 = por %p421_p8, %p420_p5 }
  0x68   : > { %p423_p0 = pnand %p422_p11, %p416_p12 }
  0x6a   : > { %426 = shalt.err (!%p423_p0)
}
  0x6b   : > { %305 = dma.vmem_to_hbm [thread:$0]  (%p681_p9), %s619_s27, 128, %s624_s3, %s186_s4  }
  0x6c PF: > { %s214_s25 = sand.u32 1, %s461_s6   ;;  %p682_p7 = scmp.ne.s32.totalorder %s677_s21, 0 }
  0x6d   : > { %p683_p13 = scmp.ge.s32.totalorder %s481_s11, 2  ;;  %s215_s26 = scalar_lea.sflag [#allocation4], %s214_s25 }
  0x6f   : > { %p312_p3 = pnand %p683_p13, %p682_p7 }
  0x71   : > { %456 = dma.done.wait (!%p312_p3), %s215_s26, 128  }
  0x72   : > { %458 = vsyncadd (!%p312_p3), %s215_s26, 4294967168  ;;  %s17_s11 = sadd.s32 1, %s481_s11   ;;  %s684_s6 = smov %s465_s7 }
  0x73   : > { %p14_p6 = scmp.ge.s32.totalorder %s17_s11, 4   ;;  %s685_s7 = smov %s469_s8 }
  0x74   : > { %s686_s8 = smov %s551_s20  ;;  %s687_s9 = smov %s477_s10 }
  0x75   : > { %s688_s10 = smov %s690_s14  ;;  %16 = sbr.rel (!%p14_p6) target bundleno = 6 (0x6), region = 69 }
  0x7c   :  { %220 = vsyncpa [#allocation3], 1 }
  0x7d   :  { %222 = vsyncpa [#allocation3 + $0x1], 1 }
  0x7e   :  { %223 = vsyncpa [#allocation4], 1 }
  0x7f   :  { %225 = vsyncpa [#allocation4 + $0x1], 1 }

</bundles_post_ra>
